<compile_context>
chip_gen: v5e
topology: v5e:2x2
jax: 0.10.0
libtpu: 0.0.40
codegen_flags: <defaults>
</compile_context>

<pallas_src>
import functools

import jax
import jax.numpy as jnp
from jax.experimental import pallas as pl
from jax.experimental.pallas import tpu as pltpu

SEQ_LEN = 8
BATCH = 1
INPUT_SIZE = 4
HIDDEN_SIZE = 4
NUM_LAYERS = 1  # single-layer Elman RNN


def _align8(n):
    return ((n + 7) // 8) * 8


def _offsets(seq, width):
    """Row offsets of each operand inside the packed (rows, width) array."""
    off = {}
    r = 0
    off["x"] = r;      r += _align8(seq)
    off["wih_t"] = r;  r += _align8(width)
    off["whh"] = r;    r += _align8(width)
    off["whh_t"] = r;  r += _align8(width)
    off["bias"] = r;   r += 8
    off["eye"] = r;    r += _align8(width)
    return off, r


def _rnn_kernel(p_ref, out_ref, *, seq, width, off):
    """Single-layer tanh RNN, batch squeezed to 1, all operands in one VMEM block.

    p_ref   : (rows, width) f32 VMEM — packed x / W_ih^T / W_hh / W_hh^T / bias / I
    out_ref : (seq, width)  f32 VMEM — hidden states, one row per timestep
    """
    # Static views into the single packed operand block (one DMA, zero-cost views).
    x     = p_ref[off["x"]:off["x"] + seq, :]              # (seq, W)  zero-padded cols
    wih_t = p_ref[off["wih_t"]:off["wih_t"] + width, :]    # (W, W)    W_ih^T (zero-padded)
    whh   = p_ref[off["whh"]:off["whh"] + width, :]        # (W, W)    W_hh
    whh_t = p_ref[off["whh_t"]:off["whh_t"] + width, :]    # (W, W)    W_hh^T
    bias  = p_ref[off["bias"]:off["bias"] + 1, :]          # (1, W)    b_ih + b_hh
    eye   = p_ref[off["eye"]:off["eye"] + width, :]        # (W, W)    identity

    # Prologue: every timestep's input projection in ONE MXU matmul, bias fused.
    # Zero-padded rows/cols contribute nothing. Off the serial h->h chain.
    # TODO(synk): if the bundle dump shows step 0 stalling on the MXU result pop,
    # redundantly compute xproj row 0 on the VPU so the recurrence starts earlier.
    xproj = jnp.dot(x, wih_t, preferred_element_type=jnp.float32) + bias  # (seq, W)

    # h0 = zeros (matches torch). The recurrence alternates layouts so each
    # step's reduce lands in the orientation the next step consumes:
    #   even t : h lane-major  (1,W) -> lane-reduce    -> h sublane-major (W,1)
    #   odd  t : h sublane-major (W,1) -> sublane-reduce -> h lane-major  (1,W)
    # Critical path per step: VPU mul -> XLU reduce -> VPU add -> EUP tanh.
    h_lane = jnp.zeros((1, width), jnp.float32)
    h_sub = jnp.zeros((width, 1), jnp.float32)

    for t in range(seq):                       # static unroll (seq is compile-time)
        xp_row = xproj[t:t + 1, :]             # (1, W); depends only on xproj
        if t % 2 == 0:
            # rec[j] = sum_k Whh[j,k] * h[k]   (result sublane-major)
            rec = jnp.sum(whh * h_lane, axis=1, keepdims=True)       # (W, 1)
            # xproj row re-oriented to sublane-major — off the h->h chain.
            xp_sub = jnp.sum(eye * xp_row, axis=1, keepdims=True)    # (W, 1)
            h_sub = jnp.tanh(rec + xp_sub)                           # (W, 1)
            # Per-step row store (vst slot, off the serial chain).
            out_ref[t:t + 1, :] = jnp.sum(eye * h_sub, axis=0, keepdims=True)
        else:
            # rec[j] = sum_k Whh[j,k] * h[k]   (result lane-major)
            rec = jnp.sum(whh_t * h_sub, axis=0, keepdims=True)      # (1, W)
            h_lane = jnp.tanh(rec + xp_row)                          # (1, W)
            out_ref[t:t + 1, :] = h_lane


@jax.jit
def rnn_forward(x, w_ih, w_hh, b_ih, b_hh):
    """out, _ = nn.RNN(...)(x, h0=0); return out.view(-1, hidden_size)."""
    seq, batch, input_size = x.shape
    hidden = w_hh.shape[0]
    # The flatten below is only correct for batch == 1 (module fixes batch_size=1).
    assert batch == 1, "kernel implements the module's fixed batch_size == 1"
    width = max(input_size, hidden)
    off, rows = _offsets(seq, width)

    # Single packed operand -> one input DMA. If the weights are reused across
    # many calls, hoist the weight rows of this pack out of the per-call path.
    x2d = x[:, 0, :].astype(jnp.float32)
    p = jnp.zeros((rows, width), jnp.float32)
    p = p.at[off["x"]:off["x"] + seq, :input_size].set(x2d)
    p = p.at[off["wih_t"]:off["wih_t"] + input_size, :hidden].set(w_ih.astype(jnp.float32).T)
    p = p.at[off["whh"]:off["whh"] + hidden, :hidden].set(w_hh.astype(jnp.float32))
    p = p.at[off["whh_t"]:off["whh_t"] + hidden, :hidden].set(w_hh.astype(jnp.float32).T)
    p = p.at[off["bias"], :hidden].set((b_ih + b_hh).astype(jnp.float32))
    p = p.at[off["eye"]:off["eye"] + width, :width].set(jnp.eye(width, dtype=jnp.float32))

    vmem = pl.BlockSpec(memory_space=pltpu.MemorySpace.VMEM)
    kernel = functools.partial(_rnn_kernel, seq=seq, width=width, off=off)
    # TODO(synk): for batch > 1 / many independent sequences, add a leading
    # "parallel" grid axis over them so v7x's second TensorCore is used.
    out = pl.pallas_call(
        kernel,
        out_shape=jax.ShapeDtypeStruct((seq, width), jnp.float32),
        in_specs=[vmem],
        out_specs=vmem,
    )(p)

    # out.view(-1, hidden_size); batch == 1 so the seq-major flatten is exact.
    return out[:, :hidden].reshape(seq * batch, hidden)


def _reference(x, w_ih, w_hh, b_ih, b_hh):
    """Pure-JAX reference matching torch.nn.RNN (tanh) semantics."""
    seq, batch, _ = x.shape
    hidden = w_hh.shape[0]
    h = jnp.zeros((batch, hidden), jnp.float32)
    outs = []
    for t in range(seq):
        h = jnp.tanh(x[t] @ w_ih.T + b_ih + h @ w_hh.T + b_hh)
        outs.append(h)
    return jnp.stack(outs, axis=0).reshape(-1, hidden)


if __name__ == "__main__":
    key = jax.random.PRNGKey(0)
    kx, k1, k2, k3, k4 = jax.random.split(key, 5)

    # PyTorch nn.RNN initializes params ~ U(-1/sqrt(hidden), 1/sqrt(hidden)).
    bound = 1.0 / (HIDDEN_SIZE ** 0.5)
    w_ih = jax.random.uniform(k1, (HIDDEN_SIZE, INPUT_SIZE),
                              minval=-bound, maxval=bound, dtype=jnp.float32)
    w_hh = jax.random.uniform(k2, (HIDDEN_SIZE, HIDDEN_SIZE),
                              minval=-bound, maxval=bound, dtype=jnp.float32)
    b_ih = jax.random.uniform(k3, (HIDDEN_SIZE,),
                              minval=-bound, maxval=bound, dtype=jnp.float32)
    b_hh = jax.random.uniform(k4, (HIDDEN_SIZE,),
                              minval=-bound, maxval=bound, dtype=jnp.float32)

    # Input: (seq_len, batch, input_size), seq-major as PyTorch default.
    x = jax.random.normal(kx, (SEQ_LEN, BATCH, INPUT_SIZE), dtype=jnp.float32)

    out = rnn_forward(x, w_ih, w_hh, b_ih, b_hh)
    out = jax.block_until_ready(out)

    ref = _reference(x, w_ih, w_hh, b_ih, b_hh)
    assert out.shape == (SEQ_LEN * BATCH, HIDDEN_SIZE), out.shape
    assert jnp.allclose(out, ref, atol=1e-5, rtol=1e-5), "mismatch vs reference"

    print("KERNEL_OK")
</pallas_src>

<mosaic_0001>
module attributes {stable_mosaic.version = 11 : i64} {
  func.func @_rnn_kernel(%arg0: memref<48x4xf32, #tpu.memory_space<vmem>>, %arg1: memref<8x4xf32, #tpu.memory_space<vmem>>) attributes {dimension_semantics = [], scalar_prefetch = 0 : i64, scratch_operands = 0 : i64, tpu.core_type = #tpu.core_type<tc>} {
    %c0 = arith.constant 0 : index
    %c0_0 = arith.constant 0 : index
    %0 = vector.load %arg0[%c0, %c0_0] : memref<48x4xf32, #tpu.memory_space<vmem>>, vector<8x4xf32>
    %c8 = arith.constant 8 : index
    %c0_1 = arith.constant 0 : index
    %1 = vector.load %arg0[%c8, %c0_1] : memref<48x4xf32, #tpu.memory_space<vmem>>, vector<4x4xf32>
    %c16 = arith.constant 16 : index
    %c0_2 = arith.constant 0 : index
    %2 = vector.load %arg0[%c16, %c0_2] : memref<48x4xf32, #tpu.memory_space<vmem>>, vector<4x4xf32>
    %c24 = arith.constant 24 : index
    %c0_3 = arith.constant 0 : index
    %3 = vector.load %arg0[%c24, %c0_3] : memref<48x4xf32, #tpu.memory_space<vmem>>, vector<4x4xf32>
    %c32 = arith.constant 32 : index
    %c0_4 = arith.constant 0 : index
    %4 = vector.load %arg0[%c32, %c0_4] : memref<48x4xf32, #tpu.memory_space<vmem>>, vector<1x4xf32>
    %c40 = arith.constant 40 : index
    %c0_5 = arith.constant 0 : index
    %5 = vector.load %arg0[%c40, %c0_5] : memref<48x4xf32, #tpu.memory_space<vmem>>, vector<4x4xf32>
    %cst = arith.constant dense<0.000000e+00> : vector<8x4xf32>
    %6 = tpu.matmul %0, %1, %cst {dimension_numbers = #tpu.dot_dimension_numbers<[1], [0], [0], [1], [0, 0, 1, 1], [], []>} : vector<8x4xf32>, vector<4x4xf32>, vector<8x4xf32> -> vector<8x4xf32>
    %7 = vector.broadcast %4 : vector<1x4xf32> to vector<8x4xf32>
    %8 = arith.addf %6, %7 : vector<8x4xf32>
    %cst_6 = arith.constant 0.000000e+00 : f32
    %9 = vector.broadcast %cst_6 : f32 to vector<1x4xf32>
    %10 = vector.extract_strided_slice %8 {offsets = [0, 0], sizes = [1, 4], strides = [1, 1]} : vector<8x4xf32> to vector<1x4xf32>
    %11 = vector.broadcast %9 : vector<1x4xf32> to vector<4x4xf32>
    %12 = arith.mulf %2, %11 : vector<4x4xf32>
    %cst_7 = arith.constant dense<0.000000e+00> : vector<4xf32>
    %13 = vector.multi_reduction <add>, %12, %cst_7 [1] : vector<4x4xf32> to vector<4xf32>
    %14 = vector.shape_cast %13 : vector<4xf32> to vector<4x1xf32>
    %15 = vector.broadcast %10 : vector<1x4xf32> to vector<4x4xf32>
    %16 = arith.mulf %5, %15 : vector<4x4xf32>
    %cst_8 = arith.constant dense<0.000000e+00> : vector<4xf32>
    %17 = vector.multi_reduction <add>, %16, %cst_8 [1] : vector<4x4xf32> to vector<4xf32>
    %18 = vector.shape_cast %17 : vector<4xf32> to vector<4x1xf32>
    %19 = arith.addf %14, %18 : vector<4x1xf32>
    %20 = math.tanh %19 : vector<4x1xf32>
    %21 = vector.broadcast %20 : vector<4x1xf32> to vector<4x4xf32>
    %22 = arith.mulf %5, %21 : vector<4x4xf32>
    %cst_9 = arith.constant dense<0.000000e+00> : vector<4xf32>
    %23 = vector.multi_reduction <add>, %22, %cst_9 [0] : vector<4x4xf32> to vector<4xf32>
    %24 = vector.shape_cast %23 : vector<4xf32> to vector<1x4xf32>
    %c0_10 = arith.constant 0 : index
    %c0_11 = arith.constant 0 : index
    %25 = vector.load %arg1[%c0_10, %c0_11] : memref<8x4xf32, #tpu.memory_space<vmem>>, vector<1x4xf32>
    tpu.vector_store %arg1[%c0_10, %c0_11], %24 {strides = array<i32>} : memref<8x4xf32, #tpu.memory_space<vmem>>, vector<1x4xf32>,
    %26 = vector.extract_strided_slice %8 {offsets = [1, 0], sizes = [1, 4], strides = [1, 1]} : vector<8x4xf32> to vector<1x4xf32>
    %27 = vector.broadcast %20 : vector<4x1xf32> to vector<4x4xf32>
    %28 = arith.mulf %3, %27 : vector<4x4xf32>
    %cst_12 = arith.constant dense<0.000000e+00> : vector<4xf32>
    %29 = vector.multi_reduction <add>, %28, %cst_12 [0] : vector<4x4xf32> to vector<4xf32>
    %30 = vector.shape_cast %29 : vector<4xf32> to vector<1x4xf32>
    %31 = arith.addf %30, %26 : vector<1x4xf32>
    %32 = math.tanh %31 : vector<1x4xf32>
    %c1 = arith.constant 1 : index
    %c0_13 = arith.constant 0 : index
    %33 = vector.load %arg1[%c1, %c0_13] : memref<8x4xf32, #tpu.memory_space<vmem>>, vector<1x4xf32>
    tpu.vector_store %arg1[%c1, %c0_13], %32 {strides = array<i32>} : memref<8x4xf32, #tpu.memory_space<vmem>>, vector<1x4xf32>,
    %34 = vector.extract_strided_slice %8 {offsets = [2, 0], sizes = [1, 4], strides = [1, 1]} : vector<8x4xf32> to vector<1x4xf32>
    %35 = vector.broadcast %32 : vector<1x4xf32> to vector<4x4xf32>
    %36 = arith.mulf %2, %35 : vector<4x4xf32>
    %cst_14 = arith.constant dense<0.000000e+00> : vector<4xf32>
    %37 = vector.multi_reduction <add>, %36, %cst_14 [1] : vector<4x4xf32> to vector<4xf32>
    %38 = vector.shape_cast %37 : vector<4xf32> to vector<4x1xf32>
    %39 = vector.broadcast %34 : vector<1x4xf32> to vector<4x4xf32>
    %40 = arith.mulf %5, %39 : vector<4x4xf32>
    %cst_15 = arith.constant dense<0.000000e+00> : vector<4xf32>
    %41 = vector.multi_reduction <add>, %40, %cst_15 [1] : vector<4x4xf32> to vector<4xf32>
    %42 = vector.shape_cast %41 : vector<4xf32> to vector<4x1xf32>
    %43 = arith.addf %38, %42 : vector<4x1xf32>
    %44 = math.tanh %43 : vector<4x1xf32>
    %45 = vector.broadcast %44 : vector<4x1xf32> to vector<4x4xf32>
    %46 = arith.mulf %5, %45 : vector<4x4xf32>
    %cst_16 = arith.constant dense<0.000000e+00> : vector<4xf32>
    %47 = vector.multi_reduction <add>, %46, %cst_16 [0] : vector<4x4xf32> to vector<4xf32>
    %48 = vector.shape_cast %47 : vector<4xf32> to vector<1x4xf32>
    %c2 = arith.constant 2 : index
    %c0_17 = arith.constant 0 : index
    %49 = vector.load %arg1[%c2, %c0_17] : memref<8x4xf32, #tpu.memory_space<vmem>>, vector<1x4xf32>
    tpu.vector_store %arg1[%c2, %c0_17], %48 {strides = array<i32>} : memref<8x4xf32, #tpu.memory_space<vmem>>, vector<1x4xf32>,
    %50 = vector.extract_strided_slice %8 {offsets = [3, 0], sizes = [1, 4], strides = [1, 1]} : vector<8x4xf32> to vector<1x4xf32>
    %51 = vector.broadcast %44 : vector<4x1xf32> to vector<4x4xf32>
    %52 = arith.mulf %3, %51 : vector<4x4xf32>
    %cst_18 = arith.constant dense<0.000000e+00> : vector<4xf32>
    %53 = vector.multi_reduction <add>, %52, %cst_18 [0] : vector<4x4xf32> to vector<4xf32>
    %54 = vector.shape_cast %53 : vector<4xf32> to vector<1x4xf32>
    %55 = arith.addf %54, %50 : vector<1x4xf32>
    %56 = math.tanh %55 : vector<1x4xf32>
    %c3 = arith.constant 3 : index
    %c0_19 = arith.constant 0 : index
    %57 = vector.load %arg1[%c3, %c0_19] : memref<8x4xf32, #tpu.memory_space<vmem>>, vector<1x4xf32>
    tpu.vector_store %arg1[%c3, %c0_19], %56 {strides = array<i32>} : memref<8x4xf32, #tpu.memory_space<vmem>>, vector<1x4xf32>,
    %58 = vector.extract_strided_slice %8 {offsets = [4, 0], sizes = [1, 4], strides = [1, 1]} : vector<8x4xf32> to vector<1x4xf32>
    %59 = vector.broadcast %56 : vector<1x4xf32> to vector<4x4xf32>
    %60 = arith.mulf %2, %59 : vector<4x4xf32>
    %cst_20 = arith.constant dense<0.000000e+00> : vector<4xf32>
    %61 = vector.multi_reduction <add>, %60, %cst_20 [1] : vector<4x4xf32> to vector<4xf32>
    %62 = vector.shape_cast %61 : vector<4xf32> to vector<4x1xf32>
    %63 = vector.broadcast %58 : vector<1x4xf32> to vector<4x4xf32>
    %64 = arith.mulf %5, %63 : vector<4x4xf32>
    %cst_21 = arith.constant dense<0.000000e+00> : vector<4xf32>
    %65 = vector.multi_reduction <add>, %64, %cst_21 [1] : vector<4x4xf32> to vector<4xf32>
    %66 = vector.shape_cast %65 : vector<4xf32> to vector<4x1xf32>
    %67 = arith.addf %62, %66 : vector<4x1xf32>
    %68 = math.tanh %67 : vector<4x1xf32>
    %69 = vector.broadcast %68 : vector<4x1xf32> to vector<4x4xf32>
    %70 = arith.mulf %5, %69 : vector<4x4xf32>
    %cst_22 = arith.constant dense<0.000000e+00> : vector<4xf32>
    %71 = vector.multi_reduction <add>, %70, %cst_22 [0] : vector<4x4xf32> to vector<4xf32>
    %72 = vector.shape_cast %71 : vector<4xf32> to vector<1x4xf32>
    %c4 = arith.constant 4 : index
    %c0_23 = arith.constant 0 : index
    %73 = vector.load %arg1[%c4, %c0_23] : memref<8x4xf32, #tpu.memory_space<vmem>>, vector<1x4xf32>
    tpu.vector_store %arg1[%c4, %c0_23], %72 {strides = array<i32>} : memref<8x4xf32, #tpu.memory_space<vmem>>, vector<1x4xf32>,
    %74 = vector.extract_strided_slice %8 {offsets = [5, 0], sizes = [1, 4], strides = [1, 1]} : vector<8x4xf32> to vector<1x4xf32>
    %75 = vector.broadcast %68 : vector<4x1xf32> to vector<4x4xf32>
    %76 = arith.mulf %3, %75 : vector<4x4xf32>
    %cst_24 = arith.constant dense<0.000000e+00> : vector<4xf32>
    %77 = vector.multi_reduction <add>, %76, %cst_24 [0] : vector<4x4xf32> to vector<4xf32>
    %78 = vector.shape_cast %77 : vector<4xf32> to vector<1x4xf32>
    %79 = arith.addf %78, %74 : vector<1x4xf32>
    %80 = math.tanh %79 : vector<1x4xf32>
    %c5 = arith.constant 5 : index
    %c0_25 = arith.constant 0 : index
    %81 = vector.load %arg1[%c5, %c0_25] : memref<8x4xf32, #tpu.memory_space<vmem>>, vector<1x4xf32>
    tpu.vector_store %arg1[%c5, %c0_25], %80 {strides = array<i32>} : memref<8x4xf32, #tpu.memory_space<vmem>>, vector<1x4xf32>,
    %82 = vector.extract_strided_slice %8 {offsets = [6, 0], sizes = [1, 4], strides = [1, 1]} : vector<8x4xf32> to vector<1x4xf32>
    %83 = vector.broadcast %80 : vector<1x4xf32> to vector<4x4xf32>
    %84 = arith.mulf %2, %83 : vector<4x4xf32>
    %cst_26 = arith.constant dense<0.000000e+00> : vector<4xf32>
    %85 = vector.multi_reduction <add>, %84, %cst_26 [1] : vector<4x4xf32> to vector<4xf32>
    %86 = vector.shape_cast %85 : vector<4xf32> to vector<4x1xf32>
    %87 = vector.broadcast %82 : vector<1x4xf32> to vector<4x4xf32>
    %88 = arith.mulf %5, %87 : vector<4x4xf32>
    %cst_27 = arith.constant dense<0.000000e+00> : vector<4xf32>
    %89 = vector.multi_reduction <add>, %88, %cst_27 [1] : vector<4x4xf32> to vector<4xf32>
    %90 = vector.shape_cast %89 : vector<4xf32> to vector<4x1xf32>
    %91 = arith.addf %86, %90 : vector<4x1xf32>
    %92 = math.tanh %91 : vector<4x1xf32>
    %93 = vector.broadcast %92 : vector<4x1xf32> to vector<4x4xf32>
    %94 = arith.mulf %5, %93 : vector<4x4xf32>
    %cst_28 = arith.constant dense<0.000000e+00> : vector<4xf32>
    %95 = vector.multi_reduction <add>, %94, %cst_28 [0] : vector<4x4xf32> to vector<4xf32>
    %96 = vector.shape_cast %95 : vector<4xf32> to vector<1x4xf32>
    %c6 = arith.constant 6 : index
    %c0_29 = arith.constant 0 : index
    %97 = vector.load %arg1[%c6, %c0_29] : memref<8x4xf32, #tpu.memory_space<vmem>>, vector<1x4xf32>
    tpu.vector_store %arg1[%c6, %c0_29], %96 {strides = array<i32>} : memref<8x4xf32, #tpu.memory_space<vmem>>, vector<1x4xf32>,
    %98 = vector.extract_strided_slice %8 {offsets = [7, 0], sizes = [1, 4], strides = [1, 1]} : vector<8x4xf32> to vector<1x4xf32>
    %99 = vector.broadcast %92 : vector<4x1xf32> to vector<4x4xf32>
    %100 = arith.mulf %3, %99 : vector<4x4xf32>
    %cst_30 = arith.constant dense<0.000000e+00> : vector<4xf32>
    %101 = vector.multi_reduction <add>, %100, %cst_30 [0] : vector<4x4xf32> to vector<4xf32>
    %102 = vector.shape_cast %101 : vector<4xf32> to vector<1x4xf32>
    %103 = arith.addf %102, %98 : vector<1x4xf32>
    %104 = math.tanh %103 : vector<1x4xf32>
    %c7 = arith.constant 7 : index
    %c0_31 = arith.constant 0 : index
    %105 = vector.load %arg1[%c7, %c0_31] : memref<8x4xf32, #tpu.memory_space<vmem>>, vector<1x4xf32>
    tpu.vector_store %arg1[%c7, %c0_31], %104 {strides = array<i32>} : memref<8x4xf32, #tpu.memory_space<vmem>>, vector<1x4xf32>,
    return
  }
}

</mosaic_0001>

<bundles_post_ra>
// kernel: rnn_forward.1
= control target key start
LH: loop header
LB: loop body
LE: loop exit
PB: predicated region body
PF: predicated region fallthrough
CT: control target
= control target key end

     0   :  { %vm19_vm0 = vcmask 1043456   ;;  %vm15_vm1 = vcmask 31744   ;;  %vm44_vm2 = vcmask 27648   ;;  %vm63_vm3 = vcmask 24576   ;;  %s303_s0 = inlined_call_operand.vmem [shape: f32[48,4], index: 0, kind: input, shape index: {}]   ;;  %s304_s1 = inlined_call_operand.vmem [shape: f32[8,4], index: 1, kind: output, shape index: {}]  }
   0x1   :  { %v9_v0 = vld [vmem:[%s303_s0 + $0x8] sm:$0xf]  ;;  %v8_v1 = vld [vmem:[%s303_s0] sm:$0xff]  ;;  %v218_v2 = vld [vmem:[%s303_s0 + $0x10] sm:$0xf]  ;;  %vm75_vm4 = vcmask 25601  }
   0x2   :  { %180 = vmatpush.msk.msra.mxu0 %vm19_vm0, %v9_v0  ;;  %v43_v3 = vmul.f32 0.0, %v218_v2  ;;  %v182_v5 = vld [vmem:[%s303_s0 + $0x20] ss:$0 sm:$0xff]  ;;  %v230_v8 = vld [vmem:[%s303_s0 + $0x28] sm:$0xf]  ;;  %vm108_vm5 = vcmask 27651  }
   0x3   :  { %181 = vmatmul.msk.f32.vlgmr.msra.gmra.mxu0 %vm15_vm1, %v8_v1  ;;  %v238_v15 = vld [vmem:[%s303_s0 + $0x18] sm:$0xf]  ;;  %vm141_vm6 = vcmask 29701   ;;  %vm174_vm7 = vcmask 31751  }
   0x4   :  { %v45_v4 = vsel %vm44_vm2, %v43_v3, 0.0 }
   0x5   :  { %46 = vadd.xlane.f32.xlu0 %v45_v4 }
  0x78   :  { %v47_v12 = vpop.xlane.xlu0 %46 }
  0x80   :  { %v40_v6 = vpop.f32.mrf.mxu0 }
  0x81   :  { %v225_v7 = vadd.f32 %v182_v5, %v40_v6 }
  0x83   :  { %v48_v9 = vperm.slane %v225_v7, 0  ;;  %v82_v38 = vperm.slane %v225_v7, 2  ;;  %v148_v41 = vperm.slane %v225_v7, 6  ;;  %v115_v6 = vperm.slane %v225_v7, 4 }
  0x85   :  { %v49_v10 = vmul.f32 %v48_v9, %v230_v8  ;;  %v83_v39 = vmul.f32 %v82_v38, %v230_v8  ;;  %v149_v42 = vmul.f32 %v148_v41, %v230_v8  ;;  %v116_v9 = vmul.f32 %v115_v6, %v230_v8 }
  0x87   :  { %v50_v11 = vsel %vm44_vm2, %v49_v10, 0.0  ;;  %v84_v40 = vsel %vm44_vm2, %v83_v39, 0.0  ;;  %v150_v43 = vsel %vm44_vm2, %v149_v42, 0.0  ;;  %v117_v10 = vsel %vm44_vm2, %v116_v9, 0.0 }
  0x88   :  { %51 = vadd.xlane.f32.xlu0 %v50_v11 }
  0xfb   :  { %v52_v13 = vpop.xlane.xlu0 %51 }
  0xfc   :  { %v53_v14 = vadd.f32 %v52_v13, %v47_v12 }
  0xfe   :  { %183 = vtanh.f32 %v53_v14 }
 0x104   :  { %v184_v16 = vpop.eup %183 }
 0x105   :  { %v55_v17 = vmul.f32 %v184_v16, %v230_v8  ;;  %v65_v18 = vmul.f32 %v184_v16, %v238_v15 }
 0x107   :  { %v56_v19 = vsel %vm44_vm2, %v55_v17, 0.0  ;;  %v66_v20 = vsel %vm44_vm2, %v65_v18, 0.0 }
 0x108   :  { %v57_v21 = vrot.slane %v56_v19, 4  ;;  %v67_v22 = vrot.slane %v66_v20, 4 }
 0x10a   :  { %v58_v23 = vadd.f32 %v57_v21, %v56_v19  ;;  %v68_v24 = vadd.f32 %v67_v22, %v66_v20 }
 0x10c   :  { %v59_v25 = vrot.slane %v58_v23, 2  ;;  %v69_v26 = vrot.slane %v68_v24, 2 }
 0x10e   :  { %v60_v27 = vadd.f32 %v59_v25, %v58_v23  ;;  %v70_v28 = vadd.f32 %v69_v26, %v68_v24 }
 0x110   :  { %v61_v29 = vrot.slane %v60_v27, 1  ;;  %v71_v30 = vrot.slane %v70_v28, 1 }
 0x112   :  { %v62_v31 = vadd.f32 %v61_v29, %v60_v27  ;;  %v72_v32 = vadd.f32 %v71_v30, %v70_v28 }
 0x114   :  { %64 = vst.msk [vmem:[%s304_s1] sm:$0x1] %vm63_vm3, %v62_v31  ;;  %v73_v33 = vadd.f32 %v72_v32, %v225_v7 }
 0x116   :  { %185 = vtanh.f32 %v73_v33 }
 0x11c   :  { %v186_v34 = vpop.eup %185 }
 0x11d   :  { %v77_v35 = vperm.slane %v186_v34, 1  ;;  %76 = vst.msk [vmem:[%s304_s1] sm:$0x2] %vm75_vm4, %v186_v34 }
 0x11f   :  { %v78_v36 = vmul.f32 %v77_v35, %v218_v2 }
 0x121   :  { %v79_v37 = vsel %vm44_vm2, %v78_v36, 0.0 }
 0x122   :  { %80 = vadd.xlane.f32.xlu1 %v79_v37 }
 0x12a   :  { %85 = vadd.xlane.f32.xlu1 %v84_v40 }
 0x132   :  { %151 = vadd.xlane.f32.xlu1 %v150_v43 }
 0x195   :  { %v81_v44 = vpop.xlane.xlu1 %80 }
 0x19d   :  { %v86_v45 = vpop.xlane.xlu1 %85 }
 0x19e   :  { %v87_v46 = vadd.f32 %v86_v45, %v81_v44 }
 0x1a0   :  { %187 = vtanh.f32 %v87_v46 }
 0x1a5   :  { %v152_v37 = vpop.xlane.xlu1 %151 }
 0x1a6   :  { %v188_v47 = vpop.eup %187 }
 0x1a7   :  { %v89_v48 = vmul.f32 %v188_v47, %v230_v8  ;;  %v98_v49 = vmul.f32 %v188_v47, %v238_v15 }
 0x1a9   :  { %v90_v50 = vsel %vm44_vm2, %v89_v48, 0.0  ;;  %v99_v51 = vsel %vm44_vm2, %v98_v49, 0.0 }
 0x1aa   :  { %v91_v52 = vrot.slane %v90_v50, 4  ;;  %v100_v53 = vrot.slane %v99_v51, 4 }
 0x1ac   :  { %v92_v54 = vadd.f32 %v91_v52, %v90_v50  ;;  %v101_v55 = vadd.f32 %v100_v53, %v99_v51 }
 0x1ae   :  { %v93_v56 = vrot.slane %v92_v54, 2  ;;  %v102_v57 = vrot.slane %v101_v55, 2 }
 0x1b0   :  { %v94_v58 = vadd.f32 %v93_v56, %v92_v54  ;;  %v103_v59 = vadd.f32 %v102_v57, %v101_v55 }
 0x1b2   :  { %v95_v60 = vrot.slane %v94_v58, 1  ;;  %v104_v61 = vrot.slane %v103_v59, 1 }
 0x1b4   :  { %v96_v62 = vadd.f32 %v95_v60, %v94_v58  ;;  %v105_v63 = vadd.f32 %v104_v61, %v103_v59 }
 0x1b6   :  { %97 = vst.msk [vmem:[%s304_s1 + $0x2] sm:$0x1] %vm63_vm3, %v96_v62  ;;  %v106_v0 = vadd.f32 %v105_v63, %v225_v7 }
 0x1b8   :  { %189 = vtanh.f32 %v106_v0 }
 0x1be   :  { %v190_v1 = vpop.eup %189 }
 0x1bf   :  { %v110_v3 = vperm.slane %v190_v1, 3  ;;  %109 = vst.msk [vmem:[%s304_s1] sm:$0x8] %vm108_vm5, %v190_v1 }
 0x1c1   :  { %v111_v4 = vmul.f32 %v110_v3, %v218_v2 }
 0x1c3   :  { %v112_v5 = vsel %vm44_vm2, %v111_v4, 0.0 }
 0x1c4   :  { %113 = vadd.xlane.f32.xlu2 %v112_v5 }
 0x1cc   :  { %118 = vadd.xlane.f32.xlu2 %v117_v10 }
 0x237   :  { %v114_v11 = vpop.xlane.xlu2 %113 }
 0x23f   :  { %v119_v12 = vpop.xlane.xlu2 %118 }
 0x240   :  { %v120_v13 = vadd.f32 %v119_v12, %v114_v11 }
 0x242   :  { %191 = vtanh.f32 %v120_v13 }
 0x248   :  { %v192_v14 = vpop.eup %191 }
 0x249   :  { %v122_v16 = vmul.f32 %v192_v14, %v230_v8  ;;  %v131_v17 = vmul.f32 %v192_v14, %v238_v15 }
 0x24b   :  { %v123_v18 = vsel %vm44_vm2, %v122_v16, 0.0  ;;  %v132_v19 = vsel %vm44_vm2, %v131_v17, 0.0 }
 0x24c   :  { %v124_v20 = vrot.slane %v123_v18, 4  ;;  %v133_v21 = vrot.slane %v132_v19, 4 }
 0x24e   :  { %v125_v22 = vadd.f32 %v124_v20, %v123_v18  ;;  %v134_v23 = vadd.f32 %v133_v21, %v132_v19 }
 0x250   :  { %v126_v24 = vrot.slane %v125_v22, 2  ;;  %v135_v25 = vrot.slane %v134_v23, 2 }
 0x252   :  { %v127_v26 = vadd.f32 %v126_v24, %v125_v22  ;;  %v136_v27 = vadd.f32 %v135_v25, %v134_v23 }
 0x254   :  { %v128_v28 = vrot.slane %v127_v26, 1  ;;  %v137_v29 = vrot.slane %v136_v27, 1 }
 0x256   :  { %v129_v30 = vadd.f32 %v128_v28, %v127_v26  ;;  %v138_v31 = vadd.f32 %v137_v29, %v136_v27 }
 0x258   :  { %130 = vst.msk [vmem:[%s304_s1 + $0x4] sm:$0x1] %vm63_vm3, %v129_v30  ;;  %v139_v32 = vadd.f32 %v138_v31, %v225_v7 }
 0x25a   :  { %193 = vtanh.f32 %v139_v32 }
 0x260   :  { %v194_v33 = vpop.eup %193 }
 0x261   :  { %v143_v34 = vperm.slane %v194_v33, 5  ;;  %142 = vst.msk [vmem:[%s304_s1] sm:$0x20] %vm141_vm6, %v194_v33 }
 0x263   :  { %v144_v35 = vmul.f32 %v143_v34, %v218_v2 }
 0x265   :  { %v145_v36 = vsel %vm44_vm2, %v144_v35, 0.0 }
 0x266   :  { %146 = vadd.xlane.f32.xlu0 %v145_v36 }
 0x2d9   :  { %v147_v38 = vpop.xlane.xlu0 %146 }
 0x2da   :  { %v153_v39 = vadd.f32 %v152_v37, %v147_v38 }
 0x2dc   :  { %195 = vtanh.f32 %v153_v39 }
 0x2e2   :  { %v196_v40 = vpop.eup %195 }
 0x2e3   :  { %v155_v41 = vmul.f32 %v196_v40, %v230_v8  ;;  %v164_v42 = vmul.f32 %v196_v40, %v238_v15 }
 0x2e5   :  { %v156_v43 = vsel %vm44_vm2, %v155_v41, 0.0  ;;  %v165_v44 = vsel %vm44_vm2, %v164_v42, 0.0 }
 0x2e6   :  { %v157_v45 = vrot.slane %v156_v43, 4  ;;  %v166_v46 = vrot.slane %v165_v44, 4 }
 0x2e8   :  { %v158_v47 = vadd.f32 %v157_v45, %v156_v43  ;;  %v167_v2 = vadd.f32 %v166_v46, %v165_v44 }
 0x2ea   :  { %v159_v48 = vrot.slane %v158_v47, 2  ;;  %v168_v49 = vrot.slane %v167_v2, 2 }
 0x2ec   :  { %v160_v50 = vadd.f32 %v159_v48, %v158_v47  ;;  %v169_v51 = vadd.f32 %v168_v49, %v167_v2 }
 0x2ee   :  { %v161_v52 = vrot.slane %v160_v50, 1  ;;  %v170_v53 = vrot.slane %v169_v51, 1 }
 0x2f0   :  { %v162_v54 = vadd.f32 %v161_v52, %v160_v50  ;;  %v171_v55 = vadd.f32 %v170_v53, %v169_v51 }
 0x2f2   :  { %163 = vst.msk [vmem:[%s304_s1 + $0x6] sm:$0x1] %vm63_vm3, %v162_v54  ;;  %v172_v8 = vadd.f32 %v171_v55, %v225_v7 }
 0x2f4   :  { %197 = vtanh.f32 %v172_v8 }
 0x2fa   :  { %v198_v15 = vpop.eup %197 }
 0x2fb   :  { %175 = vst.msk [vmem:[%s304_s1] sm:$0x80] %vm174_vm7, %v198_v15 }

</bundles_post_ra>
